<compile_context>
chip_gen: v6e
topology: v6e:2x2x1
jax: 0.10.0
libtpu: 0.0.40
codegen_flags: <defaults>
</compile_context>

<pallas_src>
import functools

import jax
import jax.numpy as jnp
from jax import lax
from jax.experimental import pallas as pl
from jax.experimental.pallas import tpu as pltpu


# ----------------------------------------------------------------------------
# Pallas kernel: one (batch, head) step of fused multi-head self-attention
# ----------------------------------------------------------------------------
def _attn_kernel(x_ref, wq_ref, wk_ref, wv_ref, wo_ref, bo_ref,
                 o_ref, acc_ref, *, scale):
    h = pl.program_id(1)

    x = x_ref[0]                                                   # (N, D)

    # Per-head projections (MXU, f32 accumulation).
    q = jnp.dot(x, wq_ref[0], preferred_element_type=jnp.float32) * scale
    k = jnp.dot(x, wk_ref[0], preferred_element_type=jnp.float32)
    v = jnp.dot(x, wv_ref[0], preferred_element_type=jnp.float32)

    # Scaled dot-product attention: (N, C) x (N, C)^T -> (N, N)
    s = lax.dot_general(q, k, (((1,), (1,)), ((), ())),
                        preferred_element_type=jnp.float32)
    s = s - jnp.max(s, axis=-1, keepdims=True)
    p = jnp.exp(s)
    p = p / jnp.sum(p, axis=-1, keepdims=True)

    o_h = jnp.dot(p, v, preferred_element_type=jnp.float32)        # (N, C)

    # Per-head slice of the output projection; summed over heads is exactly
    # concat_h(o_h) @ Wo.
    contrib = jnp.dot(o_h, wo_ref[0], preferred_element_type=jnp.float32)

    @pl.when(h == 0)
    def _():
        acc_ref[...] = jnp.zeros_like(acc_ref)

    acc_ref[...] += contrib

    @pl.when(h == pl.num_programs(1) - 1)
    def _():
        o_ref[0] = (acc_ref[...] + bo_ref[...]).astype(o_ref.dtype)


# ----------------------------------------------------------------------------
# Wrapper
# ----------------------------------------------------------------------------
def self_attention_forward(x, params, *, heads, dim_head):
    B, N, D = x.shape
    H, C = heads, dim_head
    inner = H * C
    scale = float(C) ** -0.5

    # Weight prep (cheap, one-time XLA ops outside the kernel):
    #   wq/wk/wv : (D, H*C) -> (H, D, C)   per-head projection slices
    #   wo       : (H*C, D) -> (H, C, D)   per-head output-projection slices
    wq3 = params["wq"].reshape(D, H, C).transpose(1, 0, 2)
    wk3 = params["wk"].reshape(D, H, C).transpose(1, 0, 2)
    wv3 = params["wv"].reshape(D, H, C).transpose(1, 0, 2)
    wo3 = params["wo"].reshape(H, C, D)
    bo = params["bo"].reshape(1, D)

    tok_spec = pl.BlockSpec((1, N, D), lambda b, h: (b, 0, 0))      # by batch
    w_in_spec = pl.BlockSpec((1, D, C), lambda b, h: (h, 0, 0))     # by head
    w_out_spec = pl.BlockSpec((1, C, D), lambda b, h: (h, 0, 0))    # by head
    bias_spec = pl.BlockSpec((1, D), lambda b, h: (0, 0))           # replicated

    flops = (2 * B * N * D * inner * 3          # q, k, v projections
             + 2 * B * H * N * N * C            # q @ k^T
             + 2 * B * H * N * N * C            # p @ v
             + 2 * B * N * inner * D)           # output projection
    bytes_accessed = 4 * (2 * B * N * D + 3 * D * inner + inner * D + D)

    kernel = functools.partial(_attn_kernel, scale=scale)

    out = pl.pallas_call(
        kernel,
        out_shape=jax.ShapeDtypeStruct((B, N, D), x.dtype),
        grid=(B, H),
        in_specs=[tok_spec, w_in_spec, w_in_spec, w_in_spec,
                  w_out_spec, bias_spec],
        out_specs=tok_spec,
        scratch_shapes=[pltpu.VMEM((N, D), jnp.float32)],
        compiler_params=pltpu.CompilerParams(
            dimension_semantics=("parallel", "arbitrary")),
        cost_estimate=pl.CostEstimate(
            flops=flops,
            transcendentals=B * H * N * N,
            bytes_accessed=bytes_accessed),
    )(x, wq3, wk3, wv3, wo3, bo)

    return out


# ----------------------------------------------------------------------------
# Pure-JAX reference (mirrors SelfAttention.forward_plain) for the self-test
# ----------------------------------------------------------------------------
def self_attention_ref(x, params, *, heads, dim_head):
    B, N, D = x.shape
    H, C = heads, dim_head
    q = x @ params["wq"]
    k = x @ params["wk"]
    v = x @ params["wv"]

    def split(t):
        return t.reshape(B, N, H, C).transpose(0, 2, 1, 3)          # (B,H,N,C)

    q, k, v = split(q), split(k), split(v)
    sim = jnp.einsum("bhic,bhjc->bhij", q, k) * (float(C) ** -0.5)
    attn = jax.nn.softmax(sim, axis=-1)
    out = jnp.einsum("bhij,bhjc->bhic", attn, v)
    out = out.transpose(0, 2, 1, 3).reshape(B, N, H * C)
    return out @ params["wo"] + params["bo"]


# ----------------------------------------------------------------------------
# Deterministic parameter init (shapes from SelfAttention.__init__,
# stored as (in, out) so y = x @ W matches torch's x @ W.T)
# ----------------------------------------------------------------------------
def init_params(key, query_dim, heads, dim_head):
    inner = heads * dim_head
    ks = jax.random.split(key, 5)

    def lin(k, fan_in, fan_out):
        bound = fan_in ** -0.5
        return jax.random.uniform(k, (fan_in, fan_out), jnp.float32,
                                  -bound, bound)

    return {
        "wq": lin(ks[0], query_dim, inner),      # to_q (no bias)
        "wk": lin(ks[1], query_dim, inner),      # to_k (no bias)
        "wv": lin(ks[2], query_dim, inner),      # to_v (no bias)
        "wo": lin(ks[3], inner, query_dim),      # to_out[0] weight
        "bo": (inner ** -0.5) * jax.random.uniform(
            ks[4], (query_dim,), jnp.float32, -1.0, 1.0),  # to_out[0] bias
    }


if __name__ == "__main__":
    # Small, lane-friendly test shapes consistent with the module.
    B, N = 2, 64
    query_dim, heads, dim_head = 64, 4, 32      # inner_dim = 128

    key = jax.random.PRNGKey(0)
    kx, kp = jax.random.split(key)
    x = jax.random.normal(kx, (B, N, query_dim), jnp.float32)
    params = init_params(kp, query_dim, heads, dim_head)

    out = self_attention_forward(x, params, heads=heads, dim_head=dim_head)
    out = jax.block_until_ready(out)

    ref = self_attention_ref(x, params, heads=heads, dim_head=dim_head)
    assert out.shape == (B, N, query_dim)
    max_err = float(jnp.max(jnp.abs(out - ref)))
    assert jnp.allclose(out, ref, rtol=2e-2, atol=2e-2), max_err

    print("KERNEL_OK")
</pallas_src>

<mosaic_0001>
module attributes {stable_mosaic.version = 11 : i64} {
  func.func @_attn_kernel(%arg0: i32, %arg1: i32, %arg2: memref<1x64x64xf32, #tpu.memory_space<vmem>>, %arg3: memref<1x64x32xf32, #tpu.memory_space<vmem>>, %arg4: memref<1x64x32xf32, #tpu.memory_space<vmem>>, %arg5: memref<1x64x32xf32, #tpu.memory_space<vmem>>, %arg6: memref<1x32x64xf32, #tpu.memory_space<vmem>>, %arg7: memref<1x64xf32, #tpu.memory_space<vmem>>, %arg8: memref<1x64x64xf32, #tpu.memory_space<vmem>>, %arg9: memref<64x64xf32, #tpu.memory_space<vmem>>) attributes {dimension_semantics = [#tpu.dimension_semantics<parallel>, #tpu.dimension_semantics<arbitrary>], iteration_bounds = array<i64: 2, 4>, scalar_prefetch = 0 : i64, scratch_operands = 1 : i64, tpu.core_type = #tpu.core_type<tc>, window_params = [{transform_indices = @transform_0, window_bounds = array<i64: 1, 64, 64>}, {transform_indices = @transform_1, window_bounds = array<i64: 1, 64, 32>}, {transform_indices = @transform_2, window_bounds = array<i64: 1, 64, 32>}, {transform_indices = @transform_3, window_bounds = array<i64: 1, 64, 32>}, {transform_indices = @transform_4, window_bounds = array<i64: 1, 32, 64>}, {pipeline_mode = #tpu.pipeline_mode<synchronous>, transform_indices = @transform_5, window_bounds = array<i64: 1, 64>}, {transform_indices = @transform_6, window_bounds = array<i64: 1, 64, 64>}]} {
    %c0 = arith.constant 0 : index
    %c0_0 = arith.constant 0 : index
    %c0_1 = arith.constant 0 : index
    %0 = vector.load %arg2[%c0, %c0_0, %c0_1] : memref<1x64x64xf32, #tpu.memory_space<vmem>>, vector<1x64x64xf32>
    %1 = vector.shape_cast %0 : vector<1x64x64xf32> to vector<64x64xf32>
    %c0_2 = arith.constant 0 : index
    %c0_3 = arith.constant 0 : index
    %c0_4 = arith.constant 0 : index
    %2 = vector.load %arg3[%c0_2, %c0_3, %c0_4] : memref<1x64x32xf32, #tpu.memory_space<vmem>>, vector<1x64x32xf32>
    %3 = vector.shape_cast %2 : vector<1x64x32xf32> to vector<64x32xf32>
    %cst = arith.constant dense<0.000000e+00> : vector<64x32xf32>
    %4 = tpu.matmul %1, %3, %cst {dimension_numbers = #tpu.dot_dimension_numbers<[1], [0], [0], [1], [0, 0, 1, 1], [], []>} : vector<64x64xf32>, vector<64x32xf32>, vector<64x32xf32> -> vector<64x32xf32>
    %cst_5 = arith.constant 0.176776692 : f32
    %5 = vector.broadcast %cst_5 : f32 to vector<64x32xf32>
    %6 = arith.mulf %4, %5 : vector<64x32xf32>
    %c0_6 = arith.constant 0 : index
    %c0_7 = arith.constant 0 : index
    %c0_8 = arith.constant 0 : index
    %7 = vector.load %arg4[%c0_6, %c0_7, %c0_8] : memref<1x64x32xf32, #tpu.memory_space<vmem>>, vector<1x64x32xf32>
    %8 = vector.shape_cast %7 : vector<1x64x32xf32> to vector<64x32xf32>
    %cst_9 = arith.constant dense<0.000000e+00> : vector<64x32xf32>
    %9 = tpu.matmul %1, %8, %cst_9 {dimension_numbers = #tpu.dot_dimension_numbers<[1], [0], [0], [1], [0, 0, 1, 1], [], []>} : vector<64x64xf32>, vector<64x32xf32>, vector<64x32xf32> -> vector<64x32xf32>
    %c0_10 = arith.constant 0 : index
    %c0_11 = arith.constant 0 : index
    %c0_12 = arith.constant 0 : index
    %10 = vector.load %arg5[%c0_10, %c0_11, %c0_12] : memref<1x64x32xf32, #tpu.memory_space<vmem>>, vector<1x64x32xf32>
    %11 = vector.shape_cast %10 : vector<1x64x32xf32> to vector<64x32xf32>
    %cst_13 = arith.constant dense<0.000000e+00> : vector<64x32xf32>
    %12 = tpu.matmul %1, %11, %cst_13 {dimension_numbers = #tpu.dot_dimension_numbers<[1], [0], [0], [1], [0, 0, 1, 1], [], []>} : vector<64x64xf32>, vector<64x32xf32>, vector<64x32xf32> -> vector<64x32xf32>
    %cst_14 = arith.constant dense<0.000000e+00> : vector<64x64xf32>
    %13 = tpu.matmul %6, %9, %cst_14 {dimension_numbers = #tpu.dot_dimension_numbers<[1], [1], [0], [0], [0, 0, 1, 0], [], []>} : vector<64x32xf32>, vector<64x32xf32>, vector<64x64xf32> -> vector<64x64xf32>
    %cst_15 = arith.constant dense<0xFF800000> : vector<64xf32>
    %14 = vector.multi_reduction <maximumf>, %13, %cst_15 [1] : vector<64x64xf32> to vector<64xf32>
    %15 = vector.shape_cast %14 : vector<64xf32> to vector<64x1xf32>
    %16 = vector.broadcast %15 : vector<64x1xf32> to vector<64x64xf32>
    %17 = arith.subf %13, %16 : vector<64x64xf32>
    %18 = math.exp %17 : vector<64x64xf32>
    %cst_16 = arith.constant dense<0.000000e+00> : vector<64xf32>
    %19 = vector.multi_reduction <add>, %18, %cst_16 [1] : vector<64x64xf32> to vector<64xf32>
    %20 = vector.shape_cast %19 : vector<64xf32> to vector<64x1xf32>
    %21 = vector.broadcast %20 : vector<64x1xf32> to vector<64x64xf32>
    %22 = arith.divf %18, %21 : vector<64x64xf32>
    %cst_17 = arith.constant dense<0.000000e+00> : vector<64x32xf32>
    %23 = tpu.matmul %22, %12, %cst_17 {dimension_numbers = #tpu.dot_dimension_numbers<[1], [0], [0], [1], [0, 0, 1, 1], [], []>} : vector<64x64xf32>, vector<64x32xf32>, vector<64x32xf32> -> vector<64x32xf32>
    %c0_18 = arith.constant 0 : index
    %c0_19 = arith.constant 0 : index
    %c0_20 = arith.constant 0 : index
    %24 = vector.load %arg6[%c0_18, %c0_19, %c0_20] : memref<1x32x64xf32, #tpu.memory_space<vmem>>, vector<1x32x64xf32>
    %25 = vector.shape_cast %24 : vector<1x32x64xf32> to vector<32x64xf32>
    %cst_21 = arith.constant dense<0.000000e+00> : vector<64x64xf32>
    %26 = tpu.matmul %23, %25, %cst_21 {dimension_numbers = #tpu.dot_dimension_numbers<[1], [0], [0], [1], [0, 0, 1, 1], [], []>} : vector<64x32xf32>, vector<32x64xf32>, vector<64x64xf32> -> vector<64x64xf32>
    %c0_i32 = arith.constant 0 : i32
    %27 = arith.cmpi eq, %arg1, %c0_i32 : i32
    %28 = arith.extui %27 : i1 to i32
    %c0_i32_22 = arith.constant 0 : i32
    %29 = arith.cmpi ne, %28, %c0_i32_22 : i32
    scf.if %29 {
      %cst_28 = arith.constant 0.000000e+00 : f32
      %36 = vector.broadcast %cst_28 : f32 to vector<64x64xf32>
      %c0_29 = arith.constant 0 : index
      %c0_30 = arith.constant 0 : index
      %37 = vector.load %arg9[%c0_29, %c0_30] : memref<64x64xf32, #tpu.memory_space<vmem>>, vector<64x64xf32>
      tpu.vector_store %arg9[%c0_29, %c0_30], %36 {strides = array<i32>} : memref<64x64xf32, #tpu.memory_space<vmem>>, vector<64x64xf32>,
    } else {
    }
    %c0_23 = arith.constant 0 : index
    %c0_24 = arith.constant 0 : index
    %30 = vector.load %arg9[%c0_23, %c0_24] : memref<64x64xf32, #tpu.memory_space<vmem>>, vector<64x64xf32>
    %31 = arith.addf %30, %26 : vector<64x64xf32>
    %c0_25 = arith.constant 0 : index
    %c0_26 = arith.constant 0 : index
    %32 = vector.load %arg9[%c0_25, %c0_26] : memref<64x64xf32, #tpu.memory_space<vmem>>, vector<64x64xf32>
    tpu.vector_store %arg9[%c0_25, %c0_26], %31 {strides = array<i32>} : memref<64x64xf32, #tpu.memory_space<vmem>>, vector<64x64xf32>,
    %c3_i32 = arith.constant 3 : i32
    %33 = arith.cmpi eq, %arg1, %c3_i32 : i32
    %34 = arith.extui %33 : i1 to i32
    %c0_i32_27 = arith.constant 0 : i32
    %35 = arith.cmpi ne, %34, %c0_i32_27 : i32
    scf.if %35 {
      %c0_28 = arith.constant 0 : index
      %c0_29 = arith.constant 0 : index
      %36 = vector.load %arg9[%c0_28, %c0_29] : memref<64x64xf32, #tpu.memory_space<vmem>>, vector<64x64xf32>
      %c0_30 = arith.constant 0 : index
      %c0_31 = arith.constant 0 : index
      %37 = vector.load %arg7[%c0_30, %c0_31] : memref<1x64xf32, #tpu.memory_space<vmem>>, vector<1x64xf32>
      %38 = vector.broadcast %37 : vector<1x64xf32> to vector<64x64xf32>
      %39 = arith.addf %36, %38 : vector<64x64xf32>
      %c0_32 = arith.constant 0 : index
      %c0_33 = arith.constant 0 : index
      %c0_34 = arith.constant 0 : index
      %40 = vector.load %arg8[%c0_32, %c0_33, %c0_34] : memref<1x64x64xf32, #tpu.memory_space<vmem>>, vector<1x64x64xf32>
      %41 = vector.shape_cast %40 : vector<1x64x64xf32> to vector<64x64xf32>
      %42 = vector.shape_cast %39 : vector<64x64xf32> to vector<1x64x64xf32>
      tpu.vector_store %arg8[%c0_32, %c0_33, %c0_34], %42 {strides = array<i32>} : memref<1x64x64xf32, #tpu.memory_space<vmem>>, vector<1x64x64xf32>,
    } else {
    }
    return
  }
  func.func @transform_0(%arg0: i32, %arg1: i32) -> (i32, i32, i32) {
    %c0_i32 = arith.constant 0 : i32
    %c0_i32_0 = arith.constant 0 : i32
    %c0_i32_1 = arith.constant 0 : i32
    return %arg0, %c0_i32, %c0_i32_0 : i32, i32, i32
  }
  func.func @transform_1(%arg0: i32, %arg1: i32) -> (i32, i32, i32) {
    %c0_i32 = arith.constant 0 : i32
    %c0_i32_0 = arith.constant 0 : i32
    %c0_i32_1 = arith.constant 0 : i32
    return %arg1, %c0_i32, %c0_i32_0 : i32, i32, i32
  }
  func.func @transform_2(%arg0: i32, %arg1: i32) -> (i32, i32, i32) {
    %c0_i32 = arith.constant 0 : i32
    %c0_i32_0 = arith.constant 0 : i32
    %c0_i32_1 = arith.constant 0 : i32
    return %arg1, %c0_i32, %c0_i32_0 : i32, i32, i32
  }
  func.func @transform_3(%arg0: i32, %arg1: i32) -> (i32, i32, i32) {
    %c0_i32 = arith.constant 0 : i32
    %c0_i32_0 = arith.constant 0 : i32
    %c0_i32_1 = arith.constant 0 : i32
    return %arg1, %c0_i32, %c0_i32_0 : i32, i32, i32
  }
  func.func @transform_4(%arg0: i32, %arg1: i32) -> (i32, i32, i32) {
    %c0_i32 = arith.constant 0 : i32
    %c0_i32_0 = arith.constant 0 : i32
    %c0_i32_1 = arith.constant 0 : i32
    return %arg1, %c0_i32, %c0_i32_0 : i32, i32, i32
  }
  func.func @transform_5(%arg0: i32, %arg1: i32) -> (i32, i32) {
    %c0_i32 = arith.constant 0 : i32
    %c0_i32_0 = arith.constant 0 : i32
    %c0_i32_1 = arith.constant 0 : i32
    return %c0_i32, %c0_i32_0 : i32, i32
  }
  func.func @transform_6(%arg0: i32, %arg1: i32) -> (i32, i32, i32) {
    %c0_i32 = arith.constant 0 : i32
    %c0_i32_0 = arith.constant 0 : i32
    %c0_i32_1 = arith.constant 0 : i32
    return %arg0, %c0_i32, %c0_i32_0 : i32, i32, i32
  }
}

</mosaic_0001>

<bundles_post_ra>
// kernel: tpu_custom_call.1
= control target key start
LH: loop header
LB: loop body
LE: loop exit
PB: predicated region body
PF: predicated region fallthrough
CT: control target
= control target key end

     0   :  { %11 = vsyncpa [#allocation4], 0  ;;  %s2417_s0 = inlined_call_operand.vmem [shape: f32[2,64,64], index: 0, kind: input, shape index: {}]   ;;  %s2418_s1 = inlined_call_operand.vmem [shape: f32[4,64,32], index: 1, kind: input, shape index: {}]   ;;  %s2419_s2 = inlined_call_operand.vmem [shape: f32[4,64,32], index: 2, kind: input, shape index: {}]   ;;  %s2420_s3 = inlined_call_operand.vmem [shape: f32[4,64,32], index: 3, kind: input, shape index: {}]   ;;  %s2421_s4 = inlined_call_operand.vmem [shape: f32[4,32,64], index: 4, kind: input, shape index: {}]   ;;  %s2422_s5 = inlined_call_operand.vmem [shape: f32[1,64], index: 5, kind: input, shape index: {}]   ;;  %s2423_s6 = inlined_call_operand.hbm [shape: f32[2,64,64], index: 6, kind: output, shape index: {}]  }
   0x1   :  { %13 = vsyncpa [#allocation4 + $0x1], 0  ;;  %s2025_s21 = smov 0   ;;  %s2027_s22 = smov 0  }
   0x2   :  { %s2029_s23 = smov 0   ;;  %s2031_s24 = smov 0  }
   0x3   :  { %s2033_s25 = smov 0   ;;  %s2035_s26 = smov 0  }
   0x4   :  { %s2037_s27 = smov 0   ;;  %s2039_s28 = smov 0  }
   0x5 LB: > { %s1432_s29 = sadd.s32 4294967295, %s1984_s28   ;;  %s1433_s30 = sadd.s32 4294967294, %s1984_s28   ;;  %s1984_s28 = sphi %s2039_s28, %s19_s28   ;;  %s1980_s27 = sphi %s2037_s27, %s2437_s27   ;;  %s1976_s26 = sphi %s2035_s26, %s2436_s26   ;;  %s1972_s25 = sphi %s2033_s25, %s2435_s25   ;;  %s1968_s24 = sphi %s2031_s24, %s2434_s24   ;;  %s1964_s23 = sphi %s2029_s23, %s2433_s23   ;;  %s1960_s22 = sphi %s2027_s22, %s2432_s22   ;;  %s1956_s21 = sphi %s2025_s21, %s2431_s21  }
   0x6   : > { %s28_s7 = sadd.s32 1, %s1976_s26  ;;  %s31_s8 = sadd.s32 1, %s1980_s27 }
   0x7   : > { %p29_p0 = scmp.ge.s32.totalorder %s28_s7, 4  ;;  %p199_p1 = scmp.ne.s32.totalorder %s1964_s23, %s1960_s22 }
   0x8   : > { %p200_p2 = scmp.eq.s32.totalorder %s1432_s29, 7  ;;  %p205_p4 = scmp.ne.s32.totalorder %s1960_s22, %s1956_s21 }
   0x9   : > { %s2439_s7 = smov (%p29_p0, %s28_s7), 0  ;;  %s2441_s8 = smov (!%p29_p0, %s31_s8), %s1980_s27 }
   0xa   : > { %p2074_p3 = por %p200_p2, %p199_p1  ;;  %p33_p5 = scmp.ge.s32.totalorder %s2441_s8, 2 }
   0xb   : > { %p206_p6 = scmp.eq.s32.totalorder %s1433_s30, 7  ;;  %p1436_p7 = scmp.ge.s32.totalorder %s1984_s28, 1 }
   0xc   : > { %p267_p8 = scmp.lt.s32.totalorder %s1984_s28, 9  ;;  %s2443_s8 = smov (%p33_p5, %s2441_s8), 0 }
   0xd   : > { %2427 = sst [smem:[#allocation6_spill]] %s2443_s8  ;;  %p2084_p9 = por %p206_p6, %p205_p4 }
   0xe   : > { %p268_p10 = pnand %p1436_p7, %p267_p8  ;;  %s186_s11 = ssub.s32 %s1980_s27, %s2443_s8 }
   0xf   : > { %s189_s12 = sadd.s32 1, %s1964_s23  ;;  %p187_p11 = scmp.eq.s32.totalorder %s186_s11, 0 }
  0x10   : > { %271 = sbr.rel (%p268_p10) target bundleno = 1243 (0x4db), region = 44  ;;  %p322_p12 = scmp.lt.s32.totalorder (!%p268_p10), %s1968_s24, 3 }
  0x11   : > { %s2092_s13 = scalar_select %p187_p11, %s1964_s23, %s189_s12  }
  0x12   : > { %p317_p13 = scmp.lt.s32.totalorder (!%p268_p10), %s1972_s25, 1  ;;  %s2425_s14 = sand.u32 (!%p268_p10), 1, %s1960_s22  }
  0x13   : > { %s2106_s18 = sshll.u32 (!%p268_p10), %s2425_s14, 6  ;;  %p1504_p0 = scmp.ne.s32.totalorder (!%p268_p10), %s1968_s24, 0 }
  0x15   : > { %s2098_s15 = scalar_select %p322_p12, %s1968_s24, 3  ;;  %vm358_vm0 = vcmask 523264   ;;  %vm722_vm1 = vcmask 261120  }
  0x16   : > { %s318_s16 = scalar_select %p317_p13, %s1972_s25, 1 }
  0x17   : > { %s2102_s17 = sshll.u32 %s2098_s15, 6 }
  0x18   : > { %s2112_s29 = scalar_lea.vmem %s2419_s2, %s2102_s17  ;;  %s1512_s30 = sshll.u32 %s318_s16, 6 }
  0x19   : > { %v503_v0 = vld [vmem:[%s2112_s29 + $0x38] sm:$0xff]  ;;  %v502_v1 = vld [vmem:[%s2112_s29 + $0x30] sm:$0xff]  ;;  %s2119_s8 = scalar_lea.vmem %s2417_s0, %s1512_s30  ;;  %v501_v2 = vld [vmem:[%s2112_s29 + $0x28] sm:$0xff]  ;;  %s2129_s14 = scalar_lea.vmem %s2418_s1, %s2102_s17 }
  0x1a   : > { %1638 = vmatprep.subr.mxu1 %v503_v0  ;;  %v2123_v3 = vld [vmem:[%s2119_s8] sm:$0xff]  ;;  %v357_v5 = vld [vmem:[%s2129_s14 + $0x38] sm:$0xff]  ;;  %v356_v6 = vld [vmem:[%s2129_s14 + $0x30] sm:$0xff]  ;;  %s336_s16 = scalar_lea.vmem %s2420_s3, %s2102_s17  ;;  %s1516_s17 = sshll.u32 %s2098_s15, 5 }
  0x1b   : > { %1639 = vmatpush3.msra.mxu1 %v503_v0  ;;  %1654 = vmatprep.mubr.msk.f32.mxu1 %vm358_vm0, %v2123_v3  ;;  %v500_v4 = vld [vmem:[%s2112_s29 + $0x20] sm:$0xff]  ;;  %v499_v7 = vld [vmem:[%s2112_s29 + $0x18] sm:$0xff]  ;;  %v355_v8 = vld [vmem:[%s2129_s14 + $0x28] sm:$0xff]  ;;  %s2293_s11 = scalar_lea.vmem %s2421_s4, %s1516_s17  ;;  %s2316_s15 = scalar_lea.vmem [#allocation3], %s2106_s18 }
  0x1c   : > { %1640 = vmatprep.subr.mxu1 %v502_v1  ;;  %1626 = vmatprep.mubr.msk.f32.mxu0 %vm358_vm0, %v2123_v3  ;;  %v498_v9 = vld [vmem:[%s2112_s29 + $0x10] sm:$0xff]  ;;  %v354_v10 = vld [vmem:[%s2129_s14 + $0x20] sm:$0xff]  ;;  %v497_v11 = vld [vmem:[%s2112_s29 + $0x8] sm:$0xff] }
  0x1d   : > { %1641 = vmatpush3.msra.mxu1 %v502_v1  ;;  %1610 = vmatprep.subr.mxu0 %v357_v5  ;;  %v353_v12 = vld [vmem:[%s2129_s14 + $0x18] sm:$0xff]  ;;  %v496_v13 = vld [vmem:[%s2112_s29] sm:$0xff]  ;;  %v352_v14 = vld [vmem:[%s2129_s14 + $0x10] sm:$0xff] }
  0x1e   : > { %1642 = vmatprep.subr.mxu1 %v501_v2  ;;  %1611 = vmatpush3.msra.mxu0 %v357_v5  ;;  %v2147_v15 = vld [vmem:[%s2119_s8 + $0x8] sm:$0xff]  ;;  %v2150_v16 = vld [vmem:[%s2119_s8 + $0x10] sm:$0xff]  ;;  %v350_v18 = vld [vmem:[%s2129_s14] sm:$0xff] }
  0x1f   : > { %1643 = vmatpush3.msra.mxu1 %v501_v2  ;;  %1612 = vmatprep.subr.mxu0 %v356_v6  ;;  %v351_v17 = vld [vmem:[%s2129_s14 + $0x8] sm:$0xff]  ;;  %v2159_v19 = vld [vmem:[%s2119_s8 + $0x18] sm:$0xff]  ;;  %v2162_v20 = vld [vmem:[%s2119_s8 + $0x20] sm:$0xff] }
  0x20   : > { %1644 = vmatprep.subr.mxu1 %v500_v4  ;;  %1613 = vmatpush3.msra.mxu0 %v356_v6  ;;  %v2169_v21 = vld [vmem:[%s2119_s8 + $0x28] sm:$0xff]  ;;  %v2174_v22 = vld [vmem:[%s2119_s8 + $0x30] sm:$0xff]  ;;  %v2183_v23 = vld [vmem:[%s2119_s8 + $0x38] sm:$0xff] }
  0x21   : > { %1645 = vmatpush3.msra.mxu1 %v500_v4  ;;  %1614 = vmatprep.subr.mxu0 %v355_v8  ;;  %v616_v48 = vld [vmem:[%s336_s16 + $0x38] sm:$0xff]  ;;  %v615_v49 = vld [vmem:[%s336_s16 + $0x30] sm:$0xff]  ;;  %v614_v50 = vld [vmem:[%s336_s16 + $0x28] sm:$0xff] }
  0x22   : > { %1646 = vmatprep.subr.mxu1 %v499_v7  ;;  %1615 = vmatpush3.msra.mxu0 %v355_v8  ;;  %v613_v51 = vld [vmem:[%s336_s16 + $0x20] sm:$0xff]  ;;  %v612_v52 = vld [vmem:[%s336_s16 + $0x18] sm:$0xff]  ;;  %v611_v53 = vld [vmem:[%s336_s16 + $0x10] sm:$0xff] }
  0x23   : > { %1647 = vmatpush3.msra.mxu1 %v499_v7  ;;  %1616 = vmatprep.subr.mxu0 %v354_v10  ;;  %v610_v54 = vld [vmem:[%s336_s16 + $0x8] sm:$0xff]  ;;  %v609_v55 = vld [vmem:[%s336_s16] sm:$0xff] }
  0x24   : > { %1648 = vmatprep.subr.mxu1 %v498_v9  ;;  %1617 = vmatpush3.msra.mxu0 %v354_v10 }
  0x25   : > { %1649 = vmatpush3.msra.mxu1 %v498_v9  ;;  %1618 = vmatprep.subr.mxu0 %v353_v12 }
  0x26   : > { %1650 = vmatprep.subr.mxu1 %v497_v11  ;;  %1619 = vmatpush3.msra.mxu0 %v353_v12 }
  0x27   : > { %1651 = vmatpush3.msra.mxu1 %v497_v11  ;;  %1620 = vmatprep.subr.mxu0 %v352_v14 }
  0x28   : > { %1652 = vmatprep.subr.mxu1 %v496_v13  ;;  %1621 = vmatpush3.msra.mxu0 %v352_v14 }
  0x29   : > { %1653 = vmatpush3.msra.mxu1 %v496_v13  ;;  %1622 = vmatprep.subr.mxu0 %v351_v17 }
  0x2a   : > { %1655 = vmatmul.mubr.msk.f32.vlgmr.msra.gmra.mxu1 %vm358_vm0, %v2147_v15  ;;  %1623 = vmatpush3.msra.mxu0 %v351_v17 }
  0x2b   : > { %1657 = vmatprep.mubr.msk.f32.mxu1 %vm358_vm0, %v2150_v16  ;;  %1624 = vmatprep.subr.mxu0 %v350_v18 }
  0x2c   : > { %1625 = vmatpush3.msra.mxu0 %v350_v18 }
  0x2d   : > { %1627 = vmatmul.mubr.msk.f32.vlgmr.msra.gmra.mxu0 %vm358_vm0, %v2147_v15  ;;  %1666 = vmatprep.subr.mxu0 %v616_v48 }
  0x2e   : > { %1658 = vmatmul.mubr.msk.f32.gmra.mxu1 %vm358_vm0, %v2159_v19  ;;  %1629 = vmatprep.mubr.msk.f32.mxu0 %vm358_vm0, %v2150_v16 }
  0x2f   : > { %1660 = vmatprep.mubr.msk.f32.mxu1 %vm358_vm0, %v2162_v20  ;;  %1667 = vmatpush3.msra.mxu0 %v616_v48 }
  0x30   : > { %1668 = vmatprep.subr.mxu0 %v615_v49 }
  0x31   : > { %1630 = vmatmul.mubr.msk.f32.gmra.mxu0 %vm358_vm0, %v2159_v19 }
  0x32   : > { %1661 = vmatmul.mubr.msk.f32.gmra.mxu1 %vm358_vm0, %v2169_v21  ;;  %1632 = vmatprep.mubr.msk.f32.mxu0 %vm358_vm0, %v2162_v20 }
  0x33   : > { %1663 = vmatprep.mubr.msk.f32.mxu1 %vm358_vm0, %v2174_v22  ;;  %1669 = vmatpush3.msra.mxu0 %v615_v49 }
  0x34   : > { %1670 = vmatprep.subr.mxu0 %v614_v50 }
  0x35   : > { %1633 = vmatmul.mubr.msk.f32.gmra.mxu0 %vm358_vm0, %v2169_v21 }
  0x36   : > { %1664 = vmatmul.mubr.msk.f32.gmra.mxu1 %vm358_vm0, %v2183_v23  ;;  %1635 = vmatprep.mubr.msk.f32.mxu0 %vm358_vm0, %v2174_v22 }
  0x37   : > { %1671 = vmatpush3.msra.mxu0 %v614_v50 }
  0x38   : > { %1672 = vmatprep.subr.mxu0 %v613_v51 }
  0x39   : > { %1636 = vmatmul.mubr.msk.f32.gmra.mxu0 %vm358_vm0, %v2183_v23 }
  0x3a   : > { %1682 = vmatprep.mubr.msk.f32.mxu0 %vm358_vm0, %v2123_v3  ;;  %1673 = vmatpush3.msra.mxu0 %v613_v51 }
  0x3b   : > { %1674 = vmatprep.subr.mxu0 %v612_v52 }
  0x3c   : > { %1675 = vmatpush3.msra.mxu0 %v612_v52 }
  0x3d   : > { %1676 = vmatprep.subr.mxu0 %v611_v53 }
  0x3e   : > { %1677 = vmatpush3.msra.mxu0 %v611_v53 }
  0x3f   : > { %1678 = vmatprep.subr.mxu0 %v610_v54 }
  0x40   : > { %1679 = vmatpush3.msra.mxu0 %v610_v54 }
  0x41   : > { %1680 = vmatprep.subr.mxu0 %v609_v55 }
  0x42   : > { %1681 = vmatpush3.msra.mxu0 %v609_v55 }
  0x43   : > { %1683 = vmatmul.mubr.msk.f32.vlgmr.msra.gmra.mxu0 %vm358_vm0, %v2147_v15 }
  0x44   : > { %1685 = vmatprep.mubr.msk.f32.mxu0 %vm358_vm0, %v2150_v16 }
  0x47   : > { %1686 = vmatmul.mubr.msk.f32.gmra.mxu0 %vm358_vm0, %v2159_v19 }
  0x48   : > { %1688 = vmatprep.mubr.msk.f32.mxu0 %vm358_vm0, %v2162_v20 }
  0x4b   : > { %1689 = vmatmul.mubr.msk.f32.gmra.mxu0 %vm358_vm0, %v2169_v21 }
  0x4c   : > { %1691 = vmatprep.mubr.msk.f32.mxu0 %vm358_vm0, %v2174_v22 }
  0x4f   : > { %1692 = vmatmul.mubr.msk.f32.gmra.mxu0 %vm358_vm0, %v2183_v23 }
  0xea   : > { %v1656_v24 = vpop.f32.mrf.mxu1 }
  0xec   : > { %v570_v25 = vpop.f32.mrf.mxu1 }
  0xed   : > { %v1628_v27 = vpop.f32.mrf.mxu0 }
  0xee   : > { %v1659_v26 = vpop.f32.mrf.mxu1  ;;  %v489_v40 = vmul.f32 0.17677669, %v1628_v27 }
  0xef   : > { %v449_v29 = vpop.f32.mrf.mxu0 }
  0xf0   : > { %v580_v28 = vpop.f32.mrf.mxu1  ;;  %v488_v31 = vmul.f32 0.17677669, %v449_v29 }
  0xf1   : > { %v1631_v35 = vpop.f32.mrf.mxu0 }
  0xf2   : > { %v1662_v30 = vpop.f32.mrf.mxu1  ;;  %1710 = vmatprep.mubr.msk.f32.mxu1 %vm722_vm1, %v488_v31  ;;  %v491_v43 = vmul.f32 0.17677669, %v1631_v35 }
  0xf3   : > { %v459_v36 = vpop.f32.mrf.mxu0 }
  0xf4   : > { %v590_v32 = vpop.f32.mrf.mxu1  ;;  %v490_v39 = vmul.f32 0.17677669, %v459_v36 }
  0xf5   : > { %v1634_v37 = vpop.f32.mrf.mxu0 }
  0xf6   : > { %v1665_v33 = vpop.f32.mrf.mxu1  ;;  %v493_v45 = vmul.f32 0.17677669, %v1634_v37 }
  0xf7   : > { %1694 = vmatprep.subr.msk.mxu1 %vm722_vm1, %v1665_v33  ;;  %v469_v38 = vpop.f32.mrf.mxu0 }
  0xf8   : > { %v600_v34 = vpop.f32.mrf.mxu1  ;;  %1695 = vmatpush3.xpose.msk.msra.mxu1 %vm722_vm1, %v1665_v33  ;;  %v492_v42 = vmul.f32 0.17677669, %v469_v38 }
  0xf9   : > { %1696 = vmatprep.subr.msk.mxu1 %vm722_vm1, %v600_v34  ;;  %v1637_v41 = vpop.f32.mrf.mxu0 }
  0xfa   : > { %v495_v47 = vmul.f32 0.17677669, %v1637_v41 }
  0xfb   : > { %v479_v44 = vpop.f32.mrf.mxu0 }
  0xfc   : > { %1697 = vmatpush3.xpose.msk.msra.mxu1 %vm722_vm1, %v600_v34  ;;  %v494_v46 = vmul.f32 0.17677669, %v479_v44 }
  0xfd   : > { %1698 = vmatprep.subr.msk.mxu1 %vm722_vm1, %v1662_v30 }
 0x100   : > { %1699 = vmatpush3.xpose.msk.msra.mxu1 %vm722_vm1, %v1662_v30 }
 0x101   : > { %1700 = vmatprep.subr.msk.mxu1 %vm722_vm1, %v590_v32 }
 0x103   : > { %v1684_v8 = vpop.f32.mrf.mxu0 }
 0x104   : > { %1701 = vmatpush3.xpose.msk.msra.mxu1 %vm722_vm1, %v590_v32 }
 0x105   : > { %1702 = vmatprep.subr.msk.mxu1 %vm722_vm1, %v1659_v26  ;;  %v683_v9 = vpop.f32.mrf.mxu0 }
 0x107   : > { %v1687_v10 = vpop.f32.mrf.mxu0 }
 0x108   : > { %1703 = vmatpush3.xpose.msk.msra.mxu1 %vm722_vm1, %v1659_v26 }
 0x109   : > { %1704 = vmatprep.subr.msk.mxu1 %vm722_vm1, %v580_v28  ;;  %v693_v11 = vpop.f32.mrf.mxu0 }
 0x10b   : > { %v1690_v12 = vpop.f32.mrf.mxu0 }
 0x10c   : > { %1705 = vmatpush3.xpose.msk.msra.mxu1 %vm722_vm1, %v580_v28 }
 0x10d   : > { %1706 = vmatprep.subr.msk.mxu1 %vm722_vm1, %v1656_v24  ;;  %v703_v13 = vpop.f32.mrf.mxu0 }
 0x10f   : > { %v1693_v14 = vpop.f32.mrf.mxu0 }
 0x110   : > { %1707 = vmatpush3.xpose.msk.msra.mxu1 %vm722_vm1, %v1656_v24  ;;  %1722 = vmatprep.subr.mxu0 %v1693_v14 }
 0x111   : > { %1708 = vmatprep.subr.msk.mxu1 %vm722_vm1, %v570_v25  ;;  %v713_v15 = vpop.f32.mrf.mxu0  ;;  %1723 = vmatpush3.msra.mxu0 %v1693_v14 }
 0x112   : > { %1724 = vmatprep.subr.mxu0 %v713_v15 }
 0x113   : > { %1725 = vmatpush3.msra.mxu0 %v713_v15 }
 0x114   : > { %1709 = vmatpush3.xpose.msk.msra.mxu1 %vm722_vm1, %v570_v25  ;;  %1726 = vmatprep.subr.mxu0 %v1690_v12 }
 0x115   : > { %1770 = vmatprep.subr.mxu1 %v1693_v14  ;;  %1727 = vmatpush3.msra.mxu0 %v1690_v12 }
 0x116   : > { %1728 = vmatprep.subr.mxu0 %v703_v13 }
 0x117   : > { %1711 = vmatmul.mubr.msk.f32.vlgmr.msra.gmra.mxu1 %vm722_vm1, %v489_v40  ;;  %1729 = vmatpush3.msra.mxu0 %v703_v13 }
 0x118   : > { %1713 = vmatprep.mubr.msk.f32.mxu1 %vm722_vm1, %v490_v39  ;;  %1778 = vmatpush3.msra.mxu1 %v1693_v14 }
 0x119   : > { %1771 = vmatprep.subr.mxu1 %v713_v15  ;;  %1730 = vmatprep.subr.mxu0 %v1687_v10 }
 0x11a   : > { %1779 = vmatpush3.msra.mxu1 %v713_v15  ;;  %1731 = vmatpush3.msra.mxu0 %v1687_v10 }
 0x11b   : > { %1714 = vmatmul.mubr.msk.f32.gmra.mxu1 %vm722_vm1, %v491_v43  ;;  %1772 = vmatprep.subr.mxu1 %v1690_v12 }
 0x11c   : > { %1716 = vmatprep.mubr.msk.f32.mxu1 %vm722_vm1, %v492_v42  ;;  %1780 = vmatpush3.msra.mxu1 %v1690_v12 }
 0x11d   : > { %1773 = vmatprep.subr.mxu1 %v703_v13  ;;  %1732 = vmatprep.subr.mxu0 %v693_v11 }
 0x11e   : > { %1781 = vmatpush3.msra.mxu1 %v703_v13  ;;  %1733 = vmatpush3.msra.mxu0 %v693_v11 }
 0x11f   : > { %1717 = vmatmul.mubr.msk.f32.gmra.mxu1 %vm722_vm1, %v493_v45  ;;  %1774 = vmatprep.subr.mxu1 %v1687_v10 }
 0x120   : > { %1719 = vmatprep.mubr.msk.f32.mxu1 %vm722_vm1, %v494_v46  ;;  %1782 = vmatpush3.msra.mxu1 %v1687_v10 }
 0x121   : > { %1775 = vmatprep.subr.mxu1 %v693_v11  ;;  %1734 = vmatprep.subr.mxu0 %v1684_v8 }
 0x122   : > { %1783 = vmatpush3.msra.mxu1 %v693_v11  ;;  %1735 = vmatpush3.msra.mxu0 %v1684_v8 }
 0x123   : > { %1720 = vmatmul.mubr.msk.f32.gmra.mxu1 %vm722_vm1, %v495_v47  ;;  %1776 = vmatprep.subr.mxu1 %v1684_v8 }
 0x124   : > { %1784 = vmatpush3.msra.mxu1 %v1684_v8  ;;  %1736 = vmatprep.subr.mxu0 %v683_v9 }
 0x125   : > { %1777 = vmatprep.subr.mxu1 %v683_v9  ;;  %1737 = vmatpush3.msra.mxu0 %v683_v9 }
 0x126   : > { %1785 = vmatpush3.msra.mxu1 %v683_v9  ;;  %v1094_v9 = vld [vmem:[%s2293_s11 + $0x8] sm:$0xff] }
 0x1d7   : > { %v2241_v56 = vpop.f32.mrf.mxu1 }
 0x1d8   : > { %v879_v61 = vsel %vm358_vm0, %v2241_v56, -inf }
 0x1d9   : > { %v2243_v57 = vpop.f32.mrf.mxu1 }
 0x1da   : > { %v876_v58 = vsel %vm358_vm0, %v2243_v57, -inf }
 0x1db   : > { %877 = vmax.xlane.f32.xlu0 %v876_v58  ;;  %v2247_v59 = vpop.f32.mrf.mxu1 }
 0x1dc   : > { %v885_v1 = vsel %vm358_vm0, %v2247_v59, -inf }
 0x1dd   : > { %v2249_v60 = vpop.f32.mrf.mxu1 }
 0x1de   : > { %v882_v62 = vsel %vm358_vm0, %v2249_v60, -inf }
 0x1df   : > { %880 = vmax.xlane.f32.xlu0 %v879_v61  ;;  %883 = vmax.xlane.f32.xlu1 %v882_v62  ;;  %v2255_v63 = vpop.f32.mrf.mxu1 }
 0x1e0   : > { %v891_v5 = vsel %vm358_vm0, %v2255_v63, -inf }
 0x1e1   : > { %v2257_v0 = vpop.f32.mrf.mxu1 }
 0x1e2   : > { %v888_v2 = vsel %vm358_vm0, %v2257_v0, -inf }
 0x1e3   : > { %886 = vmax.xlane.f32.xlu1 %v885_v1  ;;  %889 = vmax.xlane.f32.xlu0 %v888_v2  ;;  %v2263_v3 = vpop.f32.mrf.mxu1 }
 0x1e4   : > { %v897_v7 = vsel %vm358_vm0, %v2263_v3, -inf }
 0x1e5   : > { %v2265_v4 = vpop.f32.mrf.mxu1 }
 0x1e6   : > { %v894_v6 = vsel %vm358_vm0, %v2265_v4, -inf }
 0x1e7   : > { %892 = vmax.xlane.f32.xlu1 %v891_v5  ;;  %895 = vmax.xlane.f32.xlu0 %v894_v6 }
 0x1eb   : > { %898 = vmax.xlane.f32.xlu1 %v897_v7  ;;  %v1095_v7 = vld [vmem:[%s2293_s11 + $0x10] sm:$0xff] }
 0x264   : > { %v878_v16 = vpop.xlane.xlu0 %877 }
 0x265   : > { %v900_v17 = vsub.f32 %v2243_v57, %v878_v16 }
 0x267   : > { %v908_v18 = vmul.f32 1.442695, %v900_v17 }
 0x268   : > { %v881_v19 = vpop.xlane.xlu0 %880  ;;  %v884_v20 = vpop.xlane.xlu1 %883 }
 0x269   : > { %1860 = vpow2.f32 %v908_v18  ;;  %v901_v21 = vsub.f32 %v2241_v56, %v881_v19  ;;  %v902_v22 = vsub.f32 %v2249_v60, %v884_v20  ;;  %v1096_v56 = vld [vmem:[%s2293_s11 + $0x18] sm:$0xff]  ;;  %v1093_v19 = vld [vmem:[%s2293_s11] sm:$0xff] }
 0x26a   : > { %1750 = vmatprep.subr.mxu0 %v1096_v56 }
 0x26b   : > { %v910_v23 = vmul.f32 1.442695, %v901_v21  ;;  %v912_v24 = vmul.f32 1.442695, %v902_v22 }
 0x26c   : > { %v887_v25 = vpop.xlane.xlu1 %886  ;;  %v890_v26 = vpop.xlane.xlu0 %889 }
 0x26d   : > { %1862 = vpow2.f32 %v910_v23  ;;  %v903_v27 = vsub.f32 %v2247_v59, %v887_v25  ;;  %v904_v28 = vsub.f32 %v2257_v0, %v890_v26 }
 0x26e   : > { %1864 = vpow2.f32 %v912_v24 }
 0x26f   : > { %v914_v29 = vmul.f32 1.442695, %v903_v27  ;;  %v916_v30 = vmul.f32 1.442695, %v904_v28 }
 0x270   : > { %v893_v31 = vpop.xlane.xlu1 %892  ;;  %v896_v32 = vpop.xlane.xlu0 %895 }
 0x271   : > { %1866 = vpow2.f32 %v914_v29  ;;  %v905_v33 = vsub.f32 %v2255_v63, %v893_v31  ;;  %v906_v34 = vsub.f32 %v2265_v4, %v896_v32 }
 0x272   : > { %1868 = vpow2.f32 %v916_v30 }
 0x273   : > { %v918_v35 = vmul.f32 1.442695, %v905_v33  ;;  %v920_v36 = vmul.f32 1.442695, %v906_v34 }
 0x274   : > { %v899_v37 = vpop.xlane.xlu1 %898 }
 0x275   : > { %1870 = vpow2.f32 %v918_v35  ;;  %v907_v38 = vsub.f32 %v2263_v3, %v899_v37 }
 0x276   : > { %v1861_v39 = vpop.eup %1860  ;;  %1872 = vpow2.f32 %v920_v36 }
 0x277   : > { %v922_v40 = vmul.f32 1.442695, %v907_v38  ;;  %v924_v41 = vsel %vm358_vm0, %v1861_v39, 0.0 }
 0x278   : > { %925 = vadd.xlane.f32.xlu0 %v924_v41 }
 0x279   : > { %1874 = vpow2.f32 %v922_v40 }
 0x27a   : > { %v1863_v42 = vpop.eup %1862 }
 0x27b   : > { %v1865_v43 = vpop.eup %1864  ;;  %v927_v44 = vsel %vm358_vm0, %v1863_v42, 0.0 }
 0x27c   : > { %928 = vadd.xlane.f32.xlu1 %v927_v44  ;;  %v930_v45 = vsel %vm358_vm0, %v1865_v43, 0.0 }
 0x27d   : > { %931 = vadd.xlane.f32.xlu0 %v930_v45 }
 0x27e   : > { %v1867_v46 = vpop.eup %1866 }
 0x27f   : > { %v1869_v47 = vpop.eup %1868  ;;  %v933_v48 = vsel %vm358_vm0, %v1867_v46, 0.0 }
 0x280   : > { %934 = vadd.xlane.f32.xlu1 %v933_v48  ;;  %v936_v49 = vsel %vm358_vm0, %v1869_v47, 0.0 }
 0x281   : > { %937 = vadd.xlane.f32.xlu0 %v936_v49 }
 0x282   : > { %v1871_v50 = vpop.eup %1870 }
 0x283   : > { %v1873_v51 = vpop.eup %1872  ;;  %v939_v52 = vsel %vm358_vm0, %v1871_v50, 0.0 }
 0x284   : > { %940 = vadd.xlane.f32.xlu1 %v939_v52  ;;  %v942_v53 = vsel %vm358_vm0, %v1873_v51, 0.0 }
 0x285   : > { %943 = vadd.xlane.f32.xlu0 %v942_v53 }
 0x286   : > { %v1875_v54 = vpop.eup %1874 }
 0x287   : > { %v945_v55 = vsel %vm358_vm0, %v1875_v54, 0.0 }
 0x288   : > { %946 = vadd.xlane.f32.xlu1 %v945_v55 }
 0x301   : > { %v926_v57 = vpop.xlane.xlu0 %925 }
 0x302   : > { %1876 = vrcp.f32 %v926_v57 }
 0x305   : > { %v929_v58 = vpop.xlane.xlu1 %928 }
 0x306   : > { %1878 = vrcp.f32 %v929_v58  ;;  %v932_v59 = vpop.xlane.xlu0 %931 }
 0x307   : > { %1880 = vrcp.f32 %v932_v59 }
 0x309   : > { %v935_v60 = vpop.xlane.xlu1 %934 }
 0x30a   : > { %1882 = vrcp.f32 %v935_v60  ;;  %v938_v61 = vpop.xlane.xlu0 %937 }
 0x30b   : > { %1884 = vrcp.f32 %v938_v61 }
 0x30d   : > { %v941_v62 = vpop.xlane.xlu1 %940 }
 0x30e   : > { %1886 = vrcp.f32 %v941_v62  ;;  %v944_v63 = vpop.xlane.xlu0 %943 }
 0x30f   : > { %v1877_v0 = vpop.eup %1876  ;;  %1888 = vrcp.f32 %v944_v63 }
 0x310   : > { %v949_v1 = vmul.f32 %v1877_v0, %v1861_v39 }
 0x311   : > { %v947_v2 = vpop.xlane.xlu1 %946 }
 0x312   : > { %1890 = vrcp.f32 %v947_v2  ;;  %1738 = vmatprep.mubr.msk.f32.mxu0 %vm358_vm0, %v949_v1 }
 0x313   : > { %v1879_v3 = vpop.eup %1878 }
 0x314   : > { %v1881_v4 = vpop.eup %1880  ;;  %v951_v5 = vmul.f32 %v1879_v3, %v1863_v42 }
 0x315   : > { %v953_v6 = vmul.f32 %v1881_v4, %v1865_v43 }
 0x316   : > { %1739 = vmatmul.mubr.msk.f32.vlgmr.msra.gmra.mxu0 %vm358_vm0, %v951_v5 }
 0x317   : > { %v1883_v8 = vpop.eup %1882  ;;  %1741 = vmatprep.mubr.msk.f32.mxu0 %vm358_vm0, %v953_v6  ;;  %1751 = vmatpush3.msra.mxu0 %v1096_v56 }
 0x318   : > { %v1885_v10 = vpop.eup %1884  ;;  %v955_v11 = vmul.f32 %v1883_v8, %v1867_v46  ;;  %1752 = vmatprep.subr.mxu0 %v1095_v7 }
 0x319   : > { %v957_v12 = vmul.f32 %v1885_v10, %v1869_v47  ;;  %1753 = vmatpush3.msra.mxu0 %v1095_v7 }
 0x31a   : > { %1742 = vmatmul.mubr.msk.f32.gmra.mxu0 %vm358_vm0, %v955_v11  ;;  %1754 = vmatprep.subr.mxu0 %v1094_v9 }
 0x31b   : > { %v1887_v13 = vpop.eup %1886  ;;  %1744 = vmatprep.mubr.msk.f32.mxu1 %vm358_vm0, %v957_v12  ;;  %1755 = vmatpush3.msra.mxu0 %v1094_v9 }
 0x31c   : > { %v1889_v14 = vpop.eup %1888  ;;  %v959_v15 = vmul.f32 %v1887_v13, %v1871_v50  ;;  %1756 = vmatprep.subr.mxu0 %v1093_v19 }
 0x31d   : > { %v961_v16 = vmul.f32 %v1889_v14, %v1873_v51  ;;  %1757 = vmatpush3.msra.mxu0 %v1093_v19 }
 0x31e   : > { %1745 = vmatmul.mubr.msk.f32.vlgmr.msra.gmra.mxu1 %vm358_vm0, %v959_v15 }
 0x31f   : > { %v1891_v17 = vpop.eup %1890  ;;  %1747 = vmatprep.mubr.msk.f32.mxu1 %vm358_vm0, %v961_v16 }
 0x320   : > { %v963_v18 = vmul.f32 %v1891_v17, %v1875_v54 }
 0x322   : > { %1748 = vmatmul.mubr.msk.f32.gmra.mxu1 %vm358_vm0, %v963_v18 }
 0x3d6   : > { %v1740_v20 = vpop.f32.mrf.mxu0 }
 0x3d8   : > { %v1054_v21 = vpop.f32.mrf.mxu0 }
 0x3d9   : > { %1758 = vmatprep.mubr.msk.f32.mxu0 %vm722_vm1, %v1054_v21 }
 0x3da   : > { %v1743_v22 = vpop.f32.mrf.mxu0  ;;  %1759 = vmatmul.mubr.msk.f32.vlgmr.msra.gmra.mxu0 %vm722_vm1, %v1740_v20 }
 0x3dc   : > { %v1064_v23 = vpop.f32.mrf.mxu0 }
 0x3dd   : > { %1761 = vmatprep.mubr.msk.f32.mxu0 %vm722_vm1, %v1064_v23 }
 0x3de   : > { %v1746_v24 = vpop.f32.mrf.mxu1  ;;  %1762 = vmatmul.mubr.msk.f32.gmra.mxu0 %vm722_vm1, %v1743_v22 }
 0x3e0   : > { %v1074_v25 = vpop.f32.mrf.mxu1 }
 0x3e1   : > { %1764 = vmatprep.mubr.msk.f32.mxu0 %vm722_vm1, %v1074_v25 }
 0x3e2   : > { %v1749_v26 = vpop.f32.mrf.mxu1  ;;  %1765 = vmatmul.mubr.msk.f32.gmra.mxu0 %vm722_vm1, %v1746_v24 }
 0x3e4   : > { %v1084_v27 = vpop.f32.mrf.mxu1 }
 0x3e5   : > { %1767 = vmatprep.mubr.msk.f32.mxu0 %vm722_vm1, %v1084_v27 }
 0x3e6   : > { %1768 = vmatmul.mubr.msk.f32.gmra.mxu0 %vm722_vm1, %v1749_v26 }
 0x49a   : > { %v1760_v28 = vpop.f32.mrf.mxu0 }
 0x49c   : > { %v1187_v29 = vpop.f32.mrf.mxu0 }
 0x49e   : > { %v1763_v30 = vpop.f32.mrf.mxu0 }
 0x4a0   : > { %v1197_v31 = vpop.f32.mrf.mxu0 }
 0x4a2   : > { %v1766_v32 = vpop.f32.mrf.mxu0 }
 0x4a4   : > { %v1207_v33 = vpop.f32.mrf.mxu0  ;;  %1229 = sbr.rel (%p1504_p0) target bundleno = 1198 (0x4ae), region = 48 }
 0x4a6   : > { %v1769_v34 = vpop.f32.mrf.mxu0 }
 0x4a8   : > { %v1217_v35 = vpop.f32.mrf.mxu0 }
 0x4a9   : > { %v1986_v36 = vmov 0.0  }
 0x4aa   : > { %1230 = vst.msk [vmem:[#allocation2] sm:$0xff] %vm358_vm0, %v1986_v36  ;;  %1231 = vst.msk [vmem:[#allocation2 + $0x8] sm:$0xff] %vm358_vm0, %v1986_v36 }
 0x4ab   : > { %1232 = vst.msk [vmem:[#allocation2 + $0x10] sm:$0xff] %vm358_vm0, %v1986_v36  ;;  %1233 = vst.msk [vmem:[#allocation2 + $0x18] sm:$0xff] %vm358_vm0, %v1986_v36 }
 0x4ac   : > { %1234 = vst.msk [vmem:[#allocation2 + $0x20] sm:$0xff] %vm358_vm0, %v1986_v36  ;;  %1235 = vst.msk [vmem:[#allocation2 + $0x28] sm:$0xff] %vm358_vm0, %v1986_v36 }
 0x4ad   : > { %1236 = vst.msk [vmem:[#allocation2 + $0x30] sm:$0xff] %vm358_vm0, %v1986_v36  ;;  %1237 = vst.msk [vmem:[#allocation2 + $0x38] sm:$0xff] %vm358_vm0, %v1986_v36 }
 0x4ae PF: > { %p1505_p1 = scmp.ne.s32.totalorder %s1968_s24, 3 }
 0x4b1   : > { %v1238_v37 = vld [vmem:[#allocation2] sm:$0xff]  ;;  %v1239_v38 = vld [vmem:[#allocation2 + $0x8] sm:$0xff] }
 0x4b2   : > { %v1240_v39 = vld [vmem:[#allocation2 + $0x10] sm:$0xff]  ;;  %v1246_v40 = vadd.f32 %v1238_v37, %v1187_v29  ;;  %v1247_v41 = vadd.f32 %v1760_v28, %v1239_v38  ;;  %v1241_v43 = vld [vmem:[#allocation2 + $0x18] sm:$0xff] }
 0x4b3   : > { %v1248_v42 = vadd.f32 %v1240_v39, %v1197_v31  ;;  %v1242_v44 = vld [vmem:[#allocation2 + $0x20] sm:$0xff]  ;;  %v1243_v45 = vld [vmem:[#allocation2 + $0x28] sm:$0xff]  ;;  %v1249_v46 = vadd.f32 %v1763_v30, %v1241_v43  ;;  %1265 = sbr.rel (%p1505_p1) target bundleno = 1218 (0x4c2), region = 52 }
 0x4b4   : > { %v1250_v47 = vadd.f32 %v1242_v44, %v1207_v33  ;;  %v1251_v48 = vadd.f32 %v1766_v32, %v1243_v45  ;;  %v1244_v49 = vld [vmem:[#allocation2 + $0x30] sm:$0xff]  ;;  %v1245_v50 = vld [vmem:[#allocation2 + $0x38] sm:$0xff]  ;;  %1254 = vst.msk [vmem:[#allocation2] sm:$0xff] %vm358_vm0, %v1246_v40  ;;  %1255 = vst.msk [vmem:[#allocation2 + $0x8] sm:$0xff] %vm358_vm0, %v1247_v41 }
 0x4b5   : > { %1256 = vst.msk [vmem:[#allocation2 + $0x10] sm:$0xff] %vm358_vm0, %v1248_v42  ;;  %v1252_v51 = vadd.f32 %v1244_v49, %v1217_v35  ;;  %v1253_v52 = vadd.f32 %v1769_v34, %v1245_v50  ;;  %1257 = vst.msk [vmem:[#allocation2 + $0x18] sm:$0xff] %vm358_vm0, %v1249_v46 }
 0x4b6   : > { %1258 = vst.msk [vmem:[#allocation2 + $0x20] sm:$0xff] %vm358_vm0, %v1250_v47  ;;  %1259 = vst.msk [vmem:[#allocation2 + $0x28] sm:$0xff] %vm358_vm0, %v1251_v48 }
 0x4b7   : > { %1260 = vst.msk [vmem:[#allocation2 + $0x30] sm:$0xff] %vm358_vm0, %v1252_v51  ;;  %1261 = vst.msk [vmem:[#allocation2 + $0x38] sm:$0xff] %vm358_vm0, %v1253_v52 }
 0x4b8   : > { %v1506_v54 = vld [vmem:[%s2422_s5] ss:$0 sm:$0xff] }
 0x4bb   : > { %v1266_v53 = vld [vmem:[#allocation2] sm:$0xff]  ;;  %v1267_v55 = vld [vmem:[#allocation2 + $0x8] sm:$0xff] }
 0x4bc   : > { %v1281_v56 = vadd.f32 %v1506_v54, %v1266_v53  ;;  %v1282_v57 = vadd.f32 %v1506_v54, %v1267_v55  ;;  %v1268_v58 = vld [vmem:[#allocation2 + $0x10] sm:$0xff]  ;;  %v1269_v59 = vld [vmem:[#allocation2 + $0x18] sm:$0xff] }
 0x4bd   : > { %v1270_v60 = vld [vmem:[#allocation2 + $0x20] sm:$0xff]  ;;  %v1283_v61 = vadd.f32 %v1506_v54, %v1268_v58  ;;  %v1284_v62 = vadd.f32 %v1506_v54, %v1269_v59  ;;  %v1271_v0 = vld [vmem:[#allocation2 + $0x28] sm:$0xff] }
 0x4be   : > { %v1285_v63 = vadd.f32 %v1506_v54, %v1270_v60  ;;  %v1272_v1 = vld [vmem:[#allocation2 + $0x30] sm:$0xff]  ;;  %v1273_v2 = vld [vmem:[#allocation2 + $0x38] sm:$0xff]  ;;  %1289 = vst.msk [vmem:[%s2316_s15] sm:$0xff] %vm358_vm0, %v1281_v56  ;;  %1290 = vst.msk [vmem:[%s2316_s15 + $0x8] sm:$0xff] %vm358_vm0, %v1282_v57  ;;  %v1286_v3 = vadd.f32 %v1506_v54, %v1271_v0 }
 0x4bf   : > { %v1287_v4 = vadd.f32 %v1506_v54, %v1272_v1  ;;  %v1288_v5 = vadd.f32 %v1506_v54, %v1273_v2  ;;  %1291 = vst.msk [vmem:[%s2316_s15 + $0x10] sm:$0xff] %vm358_vm0, %v1283_v61  ;;  %1292 = vst.msk [vmem:[%s2316_s15 + $0x18] sm:$0xff] %vm358_vm0, %v1284_v62 }
 0x4c0   : > { %1293 = vst.msk [vmem:[%s2316_s15 + $0x20] sm:$0xff] %vm358_vm0, %v1285_v63  ;;  %1294 = vst.msk [vmem:[%s2316_s15 + $0x28] sm:$0xff] %vm358_vm0, %v1286_v3 }
 0x4c1   : > { %1295 = vst.msk [vmem:[%s2316_s15 + $0x30] sm:$0xff] %vm358_vm0, %v1287_v4  ;;  %1296 = vst.msk [vmem:[%s2316_s15 + $0x38] sm:$0xff] %vm358_vm0, %v1288_v5 }
 0x4c2 PF: > { %s1517_s24 = sshll.u32 %s1972_s25, 10  ;;  %s1311_s14 = sshll.u32 %s2316_s15, 4  ;;  %s2362_s14 = int_to_ptr.vmem [resolvable:$true] %s1311_s14 }
 0x4c3   : > { %s2359_s8 = scalar_lea.hbm %s2423_s6, %s1517_s24  ;;  %s2429_s16 = sand.u32 1, %s1960_s22  }
 0x4c4   : > { %s2366_s17 = scalar_lea.sflag [#allocation4], %s2429_s16  ;;  %s1892_s29 = scalar_lea.vmem %s2362_s14, 1024 }
 0x4c5   : > { %p1893_p2 = scmp.ne.s32.totalorder %s2362_s14, %s1892_s29  ;;  %s1987_s25 = smov [#allocation3]  }
 0x4c6   : > { %s1896_s30 = sshll.u32 %s1987_s25, 4  ;;  %s1897_s30 = int_to_ptr.vmem [resolvable:$false] %s1896_s30 }
 0x4c7   : > { %p1894_p4 = pnand %p1893_p2, %p2074_p3  ;;  %s1898_s11 = scalar_lea.vmem %s1897_s30, 2048 }
 0x4c8   : > { %p1899_p6 = scmp.lt.s32.totalorder %s2362_s14, %s1897_s30  ;;  %p1900_p7 = scmp.lt.s32.totalorder %s1898_s11, %s1892_s29 }
 0x4c9   : > { %p1895_p5 = pneg %p1894_p4 }
 0x4ca   : > { %p1901_p8 = por %p1900_p7, %p1899_p6 }
 0x4cc   : > { %p1902_p10 = pnand %p1901_p8, %p1895_p5 }
 0x4ce   : > { %1905 = shalt.err (!%p1902_p10)
}
 0x4cf   : > { %s1906_s15 = scalar_lea.hbm %s2359_s8, 1024  ;;  %s1910_s24 = scalar_lea.hbm %s2423_s6, 2048 }
 0x4d0   : > { %p1907_p11 = scmp.ne.s32.totalorder %s2359_s8, %s1906_s15  ;;  %p1911_p0 = scmp.lt.s32.totalorder %s2359_s8, %s2423_s6 }
 0x4d1   : > { %p1912_p1 = scmp.lt.s32.totalorder %s1910_s24, %s1906_s15 }
 0x4d2   : > { %p1908_p12 = pnand %p1907_p11, %p2074_p3 }
 0x4d3   : > { %p1913_p2 = por %p1912_p1, %p1911_p0 }
 0x4d4   : > { %p1909_p13 = pneg %p1908_p12 }
 0x4d6   : > { %p1914_p4 = pnand %p1913_p2, %p1909_p13 }
 0x4d8   : > { %1917 = shalt.err (!%p1914_p4)
}
 0x4d9   : > { %s1988_s16 = smov 128   ;;  %s1989_s29 = smov 8  }
 0x4da   : > { %1786 = dma.vmem_to_hbm [thread:$0]  (%p2074_p3), %s2362_s14, 1024, %s2359_s8, %s2366_s17, %s1988_s16, %s1988_s16, %s1989_s29  }
 0x4db PF: > { %p1792_p5 = scmp.ge.s32.totalorder %s1984_s28, 2  ;;  %s1326_s25 = sand.u32 1, %s1956_s21  }
 0x4dc   : > { %s1327_s30 = scalar_lea.sflag [#allocation4], %s1326_s25 }
 0x4dd   : > { %p1789_p6 = pnand %p1792_p5, %p2084_p9 }
 0x4df   : > { %p1790_p7 = pneg %p1789_p6 }
 0x4e1   : > { %1951 = dma.done.wait (%p1790_p7), %s1327_s30, 1024  }
 0x4e2   : > { %1953 = vsyncadd (%p1790_p7), %s1327_s30, 4294966272  ;;  %s19_s28 = sadd.s32 1, %s1984_s28   ;;  %s2430_s9 = sld [smem:[#allocation6_spill]] }
 0x4e3   : > { %p16_p8 = scmp.ge.s32.totalorder %s19_s28, 10   ;;  %s2431_s21 = smov %s1960_s22 }
 0x4e4   : > { %s2432_s22 = smov %s1964_s23  ;;  %s2433_s23 = smov %s2092_s13 }
 0x4e5   : > { %s2434_s24 = smov %s1976_s26  ;;  %s2435_s25 = smov %s1980_s27 }
 0x4e6   : > { %s2436_s26 = smov %s2439_s7  ;;  %18 = sbr.rel (!%p16_p8) target bundleno = 5 (0x5), region = 99 }
 0x4e8   : > { %s2437_s27 = smov %s2430_s9 }
 0x4eb   :  { %1332 = vsyncpa [#allocation4], 1 }
 0x4ec   :  { %1334 = vsyncpa [#allocation4 + $0x1], 1 }

</bundles_post_ra>
